<compile_context>
chip_gen: v5e
topology: v5e:2x2
jax: 0.10.0
libtpu: 0.0.40
codegen_flags: <defaults>
</compile_context>

<pallas_src>
import math

import jax
import jax.numpy as jnp
from jax.experimental import pallas as pl
from jax.experimental.pallas import tpu as pltpu


def _kl_scale_kernel(slope_ref, kl_ref, out_ref):
    # Single scalar fmul on the scalar path (SMEM -> sreg -> SMEM).
    out_ref[0] = kl_ref[0] * slope_ref[0]


def _kl_scale(kl_loss, slope):
    """Device-side `kl_loss * slope` via a minimal SMEM-only Pallas kernel."""
    kl = jnp.asarray(kl_loss, dtype=jnp.float32).reshape(1)
    slope_arr = jnp.asarray([slope], dtype=jnp.float32)
    scaled = pl.pallas_call(
        _kl_scale_kernel,
        out_shape=jax.ShapeDtypeStruct((1,), jnp.float32),
        in_specs=[
            pl.BlockSpec(memory_space=pltpu.MemorySpace.SMEM),  # slope
            pl.BlockSpec(memory_space=pltpu.MemorySpace.SMEM),  # kl_loss
        ],
        out_specs=pl.BlockSpec(memory_space=pltpu.MemorySpace.SMEM),
    )(slope_arr, kl)
    return scaled[0]


class Annealer:
    """JAX/Pallas mirror of the PyTorch Annealer (state handled in Python)."""

    def __init__(self, total_steps, shape, baseline=0.0, cyclical=False,
                 disable=False):
        self.total_steps = total_steps
        self.current_step = 0
        self.cyclical = cyclical
        self.shape = shape
        self.baseline = baseline
        if disable:
            self.shape = "none"
            self.baseline = 0.0

    # TODO(synk): PyTorch's debug print() calls in forward()/step() are omitted.
    def slope(self):
        if self.shape == "linear":
            y = self.current_step / self.total_steps
        elif self.shape == "cosine":
            y = (math.cos(math.pi * (self.current_step / self.total_steps - 1))
                 + 1) / 2
        elif self.shape == "logistic":
            # Numerically stable form of 1 / (1 + exp(total/2 - step)).
            exponent = self.total_steps / 2 - self.current_step
            if exponent >= 0:
                z = math.exp(-exponent)
                y = z / (1.0 + z)
            else:
                y = 1.0 / (1.0 + math.exp(exponent))
        elif self.shape == "none":
            y = 1.0
        else:
            raise ValueError(
                "Invalid shape for annealing function. "
                "Must be linear, cosine, or logistic.")
        return self._add_baseline(y)

    def _add_baseline(self, y):
        return y * (1 - self.baseline) + self.baseline

    def __call__(self, kl_loss):
        slope = self.slope()                 # host-side Python float
        scaled = _kl_scale(kl_loss, slope)   # device-side scalar multiply
        return (slope, scaled)

    def step(self):
        if self.current_step < self.total_steps:
            self.current_step += 1
        if self.cyclical and self.current_step >= self.total_steps:
            self.current_step = 0

    def cyclical_setter(self, value):
        if not isinstance(value, bool):
            raise ValueError(
                "Cyclical_setter method requires boolean argument (True/False)")
        self.cyclical = value


def _ref_slope(shape, current_step, total_steps, baseline):
    if shape == "linear":
        y = current_step / total_steps
    elif shape == "cosine":
        y = (math.cos(math.pi * (current_step / total_steps - 1)) + 1) / 2
    elif shape == "logistic":
        y = 1 / (1 + math.exp(total_steps / 2 - current_step))
    else:  # 'none'
        y = 1.0
    return y * (1 - baseline) + baseline


if __name__ == "__main__":
    key = jax.random.PRNGKey(0)
    # Small synthetic scalar KL-divergence loss (0-d, like PyTorch's kld).
    kl_loss = jnp.abs(jax.random.normal(key, (), dtype=jnp.float32)) * 3.0

    total_steps = 10
    baseline = 0.1

    ok = True
    for shape in ("linear", "cosine", "logistic", "none"):
        ann = Annealer(total_steps=total_steps, shape=shape, baseline=baseline)
        for _ in range(3):   # advance a few steps so the slope is non-trivial
            ann.step()
        slope, scaled = ann(kl_loss)
        jax.block_until_ready(scaled)

        ref_s = _ref_slope(ann.shape, ann.current_step, ann.total_steps,
                           ann.baseline)
        ref_kl = float(kl_loss) * ref_s
        if abs(float(slope) - ref_s) > 1e-6 or abs(float(scaled) - ref_kl) > 1e-4:
            ok = False

    # Also check the disabled path (shape forced to 'none', baseline 0).
    ann_d = Annealer(total_steps=total_steps, shape="cosine",
                     baseline=baseline, disable=True)
    slope_d, scaled_d = ann_d(kl_loss)
    jax.block_until_ready(scaled_d)
    if abs(float(slope_d) - 1.0) > 1e-6 or abs(float(scaled_d) - float(kl_loss)) > 1e-4:
        ok = False

    print("KERNEL_OK" if ok else "KERNEL_MISMATCH")
</pallas_src>

<mosaic_0001>
module attributes {stable_mosaic.version = 11 : i64} {
  func.func @_kl_scale_kernel(%arg0: memref<1xf32, #tpu.memory_space<smem>>, %arg1: memref<1xf32, #tpu.memory_space<smem>>, %arg2: memref<1xf32, #tpu.memory_space<smem>>) attributes {dimension_semantics = [], scalar_prefetch = 0 : i64, scratch_operands = 0 : i64, tpu.core_type = #tpu.core_type<tc>} {
    %c0 = arith.constant 0 : index
    %0 = memref.load %arg1[%c0] : memref<1xf32, #tpu.memory_space<smem>>
    %c0_0 = arith.constant 0 : index
    %1 = memref.load %arg0[%c0_0] : memref<1xf32, #tpu.memory_space<smem>>
    %2 = arith.mulf %0, %1 : f32
    %c0_1 = arith.constant 0 : index
    %3 = memref.load %arg2[%c0_1] : memref<1xf32, #tpu.memory_space<smem>>
    memref.store %2, %arg2[%c0_1] : memref<1xf32, #tpu.memory_space<smem>>
    return
  }
}

</mosaic_0001>

<bundles_post_ra>
// kernel: tpu_custom_call.1
= control target key start
LH: loop header
LB: loop body
LE: loop exit
PB: predicated region body
PF: predicated region fallthrough
CT: control target
= control target key end

     0   :  { %9 = vsyncpa [#allocation5], 0  ;;  %s49_s17 = smov [#allocation4]   ;;  %s74_s0 = inlined_call_operand.<no memory space> [shape: f32[1], index: 0, kind: input, shape index: {}]   ;;  %s75_s1 = inlined_call_operand.<no memory space> [shape: f32[1], index: 1, kind: input, shape index: {}]   ;;  %s76_s2 = inlined_call_operand.hbm [shape: f32[1], index: 2, kind: output, shape index: {}]  }
   0x1   :  { %s16_s13 = smul.f32 %s75_s1, %s74_s0  ;;  %s24_s16 = sshll.u32 %s76_s2, 4  ;;  %s25_s16 = int_to_ptr.hbm [resolvable:$true] %s24_s16 }
   0x3   :  { %18 = sst [smem:[#allocation4]] %s16_s13 }
   0x4   :  { %27 = dma.smem_to_hbm %s49_s17, 16, %s25_s16, [#allocation5]  }
   0x5   :  { %47 = dma.done.wait [#allocation5], 16  }
   0x6   :  { %48 = vsyncadd [#allocation5], 4294967280 }
   0x7   :  { %32 = sfence }
   0x8   :  { %33 = vsyncpa [#allocation5], 1 }

</bundles_post_ra>
